<compile_context>
chip_gen: v7x
topology: tpu7x:2x2x1
jax: 0.10.0
libtpu: 0.0.40
codegen_flags: <defaults>
</compile_context>

<pallas_src>
import jax
import jax.numpy as jnp
from jax.experimental import pallas as pl
from jax.experimental.pallas import tpu as pltpu


# ---------------------------------------------------------------------------
# Kernels
# ---------------------------------------------------------------------------

def _gram_small_kernel(x_ref, w_ref, o_ref):
    """VPU/XLU path for N <= 8.

    x_ref: (N, K) f32, w_ref: (1, K) f32, o_ref: (N, N) f32.
    out[n, m] = sum_k (w*x)[n, k] * (w*x)[m, k]

    At this size the MXU would be <0.1% utilized and pay weight-push +
    result-FIFO drain latency, so do N row-broadcast multiplies (VPU) and
    lane reductions (XLU) instead.  Also covers the N == 1 case.
    """
    x2 = x_ref[...] * w_ref[...]                    # fused "weight * x1"
    n = o_ref.shape[1]                               # static
    cols = [
        jnp.sum(x2 * x2[m:m + 1, :], axis=1, keepdims=True)   # (N, 1)
        for m in range(n)
    ]
    o_ref[...] = cols[0] if n == 1 else jnp.concatenate(cols, axis=1)


def _gram_mxu_kernel(x_ref, w_ref, o_ref):
    """MXU path for larger N: Gram matrix A @ A^T on the matrix unit."""
    x2 = x_ref[...] * w_ref[...]                    # fused "weight * x1"
    o_ref[...] = jax.lax.dot_general(
        x2, x2,
        dimension_numbers=(((1,), (1,)), ((), ())),
        precision=jax.lax.Precision.HIGHEST,        # keep true f32 accumulation
        preferred_element_type=jnp.float32,
    )


# ---------------------------------------------------------------------------
# Wrapper
# ---------------------------------------------------------------------------

_SMALL_N_VPU_THRESHOLD = 8


@jax.jit
def model_forward(x1, weight):
    """x1: (N, C, H, W) f32, weight: (C, H, W) f32  ->  (N, N, 1, 1) f32."""
    N, C, H, W = x1.shape
    assert weight.shape == (C, H, W), (weight.shape, (C, H, W))
    K = C * H * W

    # No host-side padding, no broadcasted-weight materialization: pass the raw
    # flattened input and a single weight row; full-extent blocks are padded to
    # (8, 128) tiles internally by Mosaic.
    # TODO(synk): if xprof ever shows the 48-byte w_row DMA on the critical
    # path, fold it into the x DMA as an extra row (one descriptor).
    x_flat = x1.reshape(N, K).astype(jnp.float32)
    w_row = weight.reshape(1, K).astype(jnp.float32)

    kernel = _gram_small_kernel if N <= _SMALL_N_VPU_THRESHOLD else _gram_mxu_kernel

    cost = pl.CostEstimate(
        flops=2 * N * N * K + N * K,
        bytes_accessed=4 * (N * K + K + N * N),
        transcendentals=0,
    )

    # Single invocation (grid=()), whole arrays resident in VMEM — at this
    # problem size the op is dispatch-bound, so avoid any per-grid-step cost.
    # TODO(synk): if ever batched over many Gram problems / large N, add a
    # "parallel" grid axis (v7x: 2 TensorCores, 64 MiB VMEM), a lane-dense
    # (128-padded) output spec, and bf16 MXU operands; at N <= 16 none matter.
    out = pl.pallas_call(
        kernel,
        out_shape=jax.ShapeDtypeStruct((N, N), jnp.float32),
        in_specs=[
            pl.BlockSpec(memory_space=pltpu.MemorySpace.VMEM),
            pl.BlockSpec(memory_space=pltpu.MemorySpace.VMEM),
        ],
        out_specs=pl.BlockSpec(memory_space=pltpu.MemorySpace.VMEM),
        cost_estimate=cost,
    )(x_flat, w_row)

    return out.reshape(N, N, 1, 1)


def _reference(x1, weight):
    x2 = weight[None].astype(jnp.float32) * x1.astype(jnp.float32)
    N = x1.shape[0]
    return jnp.einsum("nchw,mchw->nm", x2, x2).reshape(N, N, 1, 1)


if __name__ == "__main__":
    key = jax.random.PRNGKey(0)
    C, H, W = 2, 2, 3
    weight = jnp.ones((C, H, W), dtype=jnp.float32)   # torch.ones(2, 2, 3)

    # Case 1: batch of 1 (matches the module's literal batch size; spatial
    # shape made broadcast-consistent with the (2, 2, 3) weight).
    x1_a = jax.random.normal(key, (1, C, H, W), dtype=jnp.float32)
    out_a = jax.block_until_ready(model_forward(x1_a, weight))
    ref_a = _reference(x1_a, weight)
    assert out_a.shape == (1, 1, 1, 1)
    assert jnp.allclose(out_a, ref_a, rtol=1e-5, atol=1e-5)

    # Case 2: small batch — exercises the VPU/XLU Gram path (N <= 8).
    key2 = jax.random.fold_in(key, 1)
    x1_b = jax.random.normal(key2, (4, C, H, W), dtype=jnp.float32)
    out_b = jax.block_until_ready(model_forward(x1_b, weight))
    ref_b = _reference(x1_b, weight)
    assert out_b.shape == (4, 4, 1, 1)
    assert jnp.allclose(out_b, ref_b, rtol=1e-5, atol=1e-5)

    # Case 3: larger batch — exercises the MXU Gram path (N > 8).
    key3 = jax.random.fold_in(key, 2)
    x1_c = jax.random.normal(key3, (16, C, H, W), dtype=jnp.float32)
    out_c = jax.block_until_ready(model_forward(x1_c, weight))
    ref_c = _reference(x1_c, weight)
    assert out_c.shape == (16, 16, 1, 1)
    assert jnp.allclose(out_c, ref_c, rtol=1e-5, atol=1e-5)

    print("KERNEL_OK")
</pallas_src>

<mosaic_0001>
module attributes {stable_mosaic.version = 11 : i64} {
  func.func @_gram_small_kernel(%arg0: memref<1x12xf32, #tpu.memory_space<vmem>>, %arg1: memref<1x12xf32, #tpu.memory_space<vmem>>, %arg2: memref<1x1xf32, #tpu.memory_space<vmem>>) attributes {dimension_semantics = [], scalar_prefetch = 0 : i64, scratch_operands = 0 : i64, tpu.core_type = #tpu.core_type<tc>} {
    %c0 = arith.constant 0 : index
    %c0_0 = arith.constant 0 : index
    %0 = vector.load %arg0[%c0, %c0_0] : memref<1x12xf32, #tpu.memory_space<vmem>>, vector<1x12xf32>
    %c0_1 = arith.constant 0 : index
    %c0_2 = arith.constant 0 : index
    %1 = vector.load %arg1[%c0_1, %c0_2] : memref<1x12xf32, #tpu.memory_space<vmem>>, vector<1x12xf32>
    %2 = arith.mulf %0, %1 : vector<1x12xf32>
    %3 = arith.mulf %2, %2 : vector<1x12xf32>
    %cst = arith.constant dense<0.000000e+00> : vector<1xf32>
    %4 = vector.multi_reduction <add>, %3, %cst [1] : vector<1x12xf32> to vector<1xf32>
    %5 = vector.shape_cast %4 : vector<1xf32> to vector<1x1xf32>
    %c0_3 = arith.constant 0 : index
    %c0_4 = arith.constant 0 : index
    %6 = vector.load %arg2[%c0_3, %c0_4] : memref<1x1xf32, #tpu.memory_space<vmem>>, vector<1x1xf32>
    tpu.vector_store %arg2[%c0_3, %c0_4], %5 {strides = array<i32>} : memref<1x1xf32, #tpu.memory_space<vmem>>, vector<1x1xf32>,
    return
  }
}

</mosaic_0001>

<bundles_post_ra>
// kernel: model_forward.1
= control target key start
LH: loop header
LB: loop body
LE: loop exit
PB: predicated region body
PF: predicated region fallthrough
CT: control target
= control target key end

     0   :  { %s95_s0 = inlined_call_operand.vmem [shape: f32[1,12], index: 0, kind: input, shape index: {}]   ;;  %s96_s1 = inlined_call_operand.vmem [shape: f32[1,12], index: 1, kind: input, shape index: {}]   ;;  %s97_s2 = inlined_call_operand.hbm [shape: f32[1,1], index: 2, kind: output, shape index: {}]  }
   0x1   :  { %v12_v0 = vld [vmem:[%s95_s0] sm:$0x1] }
   0x2   :  { %v13_v1 = vld [vmem:[%s96_s1] sm:$0x1] }
   0x3   :  { %v14_v2 = vmul.f32 %v13_v1, %v12_v0 }
   0x4   :  { %7 = vsyncpa [#allocation3], 0  ;;  %vm16_vm0 = vcmask 90112   ;;  %s61_s13 = smov [#allocation2]   ;;  %vm20_vm1 = vcmask 0  }
   0x5   :  { %v15_v3 = vmul.f32 %v14_v2, %v14_v2  ;;  %s28_s14 = sshll.u32 %s61_s13, 4  ;;  %s29_s14 = int_to_ptr.vmem [resolvable:$true] %s28_s14 }
   0x6   :  { %s37_s15 = scalar_lea.vmem %s29_s14, 16  ;;  %s41_s16 = scalar_lea.vmem %s29_s14, 32 }
   0x7   :  { %v17_v4 = vsel %vm16_vm0, %v15_v3, 0.0  ;;  %p38_p0 = scmp.ne.s32.totalorder %s29_s14, %s37_s15  ;;  %p42_p1 = scmp.lt.s32.totalorder %s29_s14, %s29_s14 }
   0x8   :  { %18 = vadd.xlane.f32.xlu0 %v17_v4  ;;  %p43_p2 = scmp.lt.s32.totalorder %s41_s16, %s37_s15 }
   0xa   :  { %p44_p3 = por %p43_p2, %p42_p1 }
   0xc   :  { %p45_p4 = pnand %p44_p3, %p38_p0 }
  0x95   :  { %v19_v5 = vpop.xlane.xlu0 %18 }
  0x96   :  { %21 = vst.msk [vmem:[#allocation2] sm:$0x1] %vm20_vm1, %v19_v5 }
  0x97   :  { %48 = shalt.err (!%p45_p4)
}
  0x98   :  { %s49_s17 = scalar_lea.hbm %s97_s2, 16 }
  0x99   :  { %p50_p5 = scmp.ne.s32.totalorder %s97_s2, %s49_s17  ;;  %p53_p6 = scmp.lt.u32.totalorder %s49_s17, %s97_s2 }
  0x9b   :  { %p55_p7 = pnand %p53_p6, %p50_p5 }
  0x9d   :  { %58 = shalt.err (!%p55_p7)
}
  0x9e   :  { %31 = dma.vmem_to_hbm [thread:$0]  %s29_s14, 16, %s97_s2, [#allocation3]  }
  0x9f   :  { %59 = dma.done.wait [#allocation3], 16  }
  0xa0   :  { %60 = vsyncadd [#allocation3], 4294967280 }
  0xa1   :  { %35 = vsyncpa [#allocation3], 1 }

</bundles_post_ra>
